<compile_context>
chip_gen: v7x
topology: tpu7x:2x2x1
jax: 0.10.0
libtpu: 0.0.40
codegen_flags: <defaults>
</compile_context>

<pallas_src>
import math

import jax
import jax.numpy as jnp
from jax import lax
from jax.experimental import pallas as pl
from jax.experimental.pallas import tpu as pltpu


# --------------------------------------------------------------------------
# tiling / VMEM budgeting
# --------------------------------------------------------------------------
def _tpu_vmem_capacity_bytes() -> int:
    try:
        return int(pltpu.get_tpu_info().vmem_capacity_bytes)
    except Exception:
        return 64 << 20  # conservative default (v7x per-TensorCore VMEM)


def _choose_tiling(H, W, C, HW, x_itemsize, two_stage):
    """Pick the output-pixel tile width t (multiple of 128) from a VMEM budget."""
    cap = _tpu_vmem_capacity_bytes()
    budget = cap // 2  # leave headroom for compiler scratch / double buffers

    # bytes that do not scale with the tile width
    fixed = 2 * C * HW * x_itemsize      # double-buffered input image block
    fixed += C * HW * 2                  # resident bf16 image cache (scratch)
    fixed += 4 * HW * 4                  # small coordinate operands (upper bound)

    if two_stage:
        # stage-1 result + broadcast(wy) + product (all f32) + small weight slabs
        per_col = 3 * C * H * 4 + (H + W) * 4 + 2 * C * x_itemsize
    else:
        # dense (t, HW) weight slabs: wy + wx (f32) + wfull (bf16)
        per_col = HW * (4 + 4 + 2) + 2 * C * x_itemsize

    avail = max(budget - fixed, 128 * per_col)
    t = int((avail // per_col) // 128 * 128)
    t = max(128, min(t, 2048))
    hw_pad_min = pl.cdiv(HW, 128) * 128
    t = min(t, hw_pad_min)
    hw_pad = pl.cdiv(HW, t) * t

    needed = fixed + t * per_col
    vmem_limit = int(min(cap * 0.9, max(2 * needed, 32 << 20)))
    return int(t), int(hw_pad), vmem_limit


# --------------------------------------------------------------------------
# kernels
# --------------------------------------------------------------------------
def _make_kernel_separable(H, W, C):
    """Two-stage separable warp: (C*H, W) @ (W, t) then weighted y-reduction."""
    cy = (H - 1) * 0.5
    cx = (W - 1) * 0.5

    def kernel(trig_ref, oy_ref, ox_ref, x_ref, o_ref, img_ref):
        b = pl.program_id(0)
        j = pl.program_id(1)

        # image block (1, C*H, W) is resident across all j: cast to bf16 once
        @pl.when(j == 0)
        def _():
            img_ref[...] = x_ref[0].astype(jnp.bfloat16)

        cos_t = trig_ref[2 * b]
        sin_t = trig_ref[2 * b + 1]

        # hoisted output-pixel coordinates for this tile: (1, t) rows
        oy = oy_ref[...]
        ox = ox_ref[...]

        # inverse rotation (dst pixel -> src coords) about the image center
        dx = ox - cx
        dy = oy - cy
        sx = jnp.clip(cos_t * dx - sin_t * dy + cx, 0.0, W - 1.0)   # (1, t)
        sy = jnp.clip(sin_t * dx + cos_t * dy + cy, 0.0, H - 1.0)   # (1, t)

        # separable bilinear hat weights: only (H, t) and (W, t) slabs
        ys = lax.broadcasted_iota(jnp.int32, (H, 1), 0).astype(jnp.float32)
        xs = lax.broadcasted_iota(jnp.int32, (W, 1), 0).astype(jnp.float32)
        wy = jnp.maximum(0.0, 1.0 - jnp.abs(sy - ys))               # (H, t) f32
        wx = jnp.maximum(0.0, 1.0 - jnp.abs(sx - xs))               # (W, t) f32
        wx = wx.astype(jnp.bfloat16)

        # stage 1 (MXU): contract x.  (C*H, W) . (W, t) -> (C*H, t), f32 acc.
        tmp = lax.dot_general(
            img_ref[...], wx,
            (((1,), (0,)), ((), ())),
            preferred_element_type=jnp.float32,
        )
        # stage 2 (VPU/XLU): weight by wy and contract y.  O(C*H*t).
        tmp = tmp.reshape(C, H, -1) * wy[None]                      # (C, H, t)
        out = jnp.sum(tmp, axis=1)                                  # (C, t)
        o_ref[0] = out.astype(o_ref.dtype)

    return kernel


def _make_kernel_dense(H, W, HW, t_out):
    """Fallback (H % 8 != 0): dense (t, HW) weight slab + one MXU matmul."""
    cy = (H - 1) * 0.5
    cx = (W - 1) * 0.5

    def kernel(trig_ref, x_ref, o_ref, img_ref):
        b = pl.program_id(0)
        j = pl.program_id(1)

        @pl.when(j == 0)
        def _():
            img_ref[...] = x_ref[0].astype(jnp.bfloat16)

        cos_t = trig_ref[2 * b]
        sin_t = trig_ref[2 * b + 1]

        # output pixels handled by this tile: (t, 1) column
        oidx = lax.broadcasted_iota(jnp.int32, (t_out, 1), 0) + j * t_out
        oy = (oidx // W).astype(jnp.float32)
        ox = (oidx % W).astype(jnp.float32)

        # all source pixels: (1, HW) row
        pidx = lax.broadcasted_iota(jnp.int32, (1, HW), 1)
        py = (pidx // W).astype(jnp.float32)
        px = (pidx % W).astype(jnp.float32)

        dx = ox - cx
        dy = oy - cy
        sx = jnp.clip(cos_t * dx - sin_t * dy + cx, 0.0, W - 1.0)
        sy = jnp.clip(sin_t * dx + cos_t * dy + cy, 0.0, H - 1.0)

        wy = jnp.maximum(0.0, 1.0 - jnp.abs(sy - py))   # (t, HW)
        wx = jnp.maximum(0.0, 1.0 - jnp.abs(sx - px))   # (t, HW)
        wfull = (wy * wx).astype(jnp.bfloat16)

        out = lax.dot_general(
            img_ref[...], wfull,
            (((1,), (1,)), ((), ())),
            preferred_element_type=jnp.float32,
        )                                               # (C, t)
        o_ref[0] = out.astype(o_ref.dtype)

    return kernel


# --------------------------------------------------------------------------
# wrapper
# --------------------------------------------------------------------------
def diff_degree(x: jax.Array, key: jax.Array, degree: float) -> jax.Array:
    """RandomAffine(degrees=degree, p=1, padding_mode='border') forward."""
    B, C, H, W = x.shape
    HW = H * W
    two_stage = (H % 8 == 0)

    t_out, HW_pad, vmem_limit = _choose_tiling(
        H, W, C, HW, x.dtype.itemsize, two_stage)
    n_tiles = HW_pad // t_out

    # per-sample random angle in [-degree, +degree] (degrees -> radians)
    angles = jax.random.uniform(
        key, (B,), minval=-degree, maxval=degree, dtype=jnp.float32
    ) * (math.pi / 180.0)
    # flat (2B,) = [cos0, sin0, cos1, sin1, ...] -> cheap 1-D SMEM operand
    trig = jnp.stack([jnp.cos(angles), jnp.sin(angles)], axis=-1).reshape(2 * B)

    in_specs = [pl.BlockSpec(memory_space=pltpu.MemorySpace.SMEM)]  # trig
    operands = [trig]

    if two_stage:
        # hoisted output-pixel coordinates, padded to HW_pad (multiple of 128)
        opix = jnp.arange(HW_pad, dtype=jnp.int32)
        oy_row = (opix // W).astype(jnp.float32)[None, :]           # (1, HW_pad)
        ox_row = (opix % W).astype(jnp.float32)[None, :]            # (1, HW_pad)
        in_specs += [
            pl.BlockSpec((1, t_out), lambda b, j: (0, j)),
            pl.BlockSpec((1, t_out), lambda b, j: (0, j)),
        ]
        operands += [oy_row, ox_row]

        x_in = x.reshape(B, C * H, W)                               # XLA-side reshape
        in_specs.append(pl.BlockSpec((1, C * H, W), lambda b, j: (b, 0, 0)))
        operands.append(x_in)
        kernel = _make_kernel_separable(H, W, C)
        scratch = [pltpu.VMEM((C * H, W), jnp.bfloat16)]
    else:
        x_in = x.reshape(B, C, HW)
        in_specs.append(pl.BlockSpec((1, C, HW), lambda b, j: (b, 0, 0)))
        operands.append(x_in)
        kernel = _make_kernel_dense(H, W, HW, t_out)
        scratch = [pltpu.VMEM((C, HW), jnp.bfloat16)]

    cost = pl.CostEstimate(
        flops=2 * B * C * HW * HW_pad,
        transcendentals=0,
        bytes_accessed=int(
            2 * B * C * HW * x.dtype.itemsize + 2 * HW_pad * 4 + trig.size * 4),
    )

    out_flat = pl.pallas_call(
        kernel,
        out_shape=jax.ShapeDtypeStruct((B, C, HW_pad), x.dtype),
        grid=(B, n_tiles),
        in_specs=in_specs,
        out_specs=pl.BlockSpec((1, C, t_out), lambda b, j: (b, 0, j)),
        scratch_shapes=scratch,
        compiler_params=pltpu.CompilerParams(
            # B parallel (megacore shards samples), j sequential per sample
            # (required by the per-sample bf16 image cache).
            dimension_semantics=("parallel", "arbitrary"),
            vmem_limit_bytes=vmem_limit,
        ),
        cost_estimate=cost,
    )(*operands)

    return out_flat[:, :, :HW].reshape(B, C, H, W)


# --------------------------------------------------------------------------
# self-test
# --------------------------------------------------------------------------
if __name__ == "__main__":
    key = jax.random.PRNGKey(0)
    k_x, k_angle = jax.random.split(key)

    B, C, H, W = 2, 4, 16, 16
    x = jax.random.normal(k_x, (B, C, H, W), dtype=jnp.float32)
    degree = 30.0  # the module's __init__ degree argument

    y = diff_degree(x, k_angle, degree)
    jax.block_until_ready(y)
    assert y.shape == (B, C, H, W)
    assert bool(jnp.all(jnp.isfinite(y)))

    # degree == 0 => identity warp (up to the bf16 image cast)
    y0 = diff_degree(x, k_angle, 0.0)
    jax.block_until_ready(y0)
    assert bool(jnp.allclose(y0, x, atol=5e-2)), "identity-warp check failed"

    print("KERNEL_OK")
</pallas_src>

<mosaic_0001>
module attributes {stable_mosaic.version = 11 : i64} {
  func.func @kernel(%arg0: i32, %arg1: i32, %arg2: memref<4xf32, #tpu.memory_space<smem>>, %arg3: memref<1x256xf32, #tpu.memory_space<vmem>>, %arg4: memref<1x256xf32, #tpu.memory_space<vmem>>, %arg5: memref<1x64x16xf32, #tpu.memory_space<vmem>>, %arg6: memref<1x4x256xf32, #tpu.memory_space<vmem>>, %arg7: memref<64x16xbf16, #tpu.memory_space<vmem>>) attributes {dimension_semantics = [#tpu.dimension_semantics<parallel>, #tpu.dimension_semantics<arbitrary>], iteration_bounds = array<i64: 2, 1>, scalar_prefetch = 0 : i64, scratch_operands = 1 : i64, tpu.core_type = #tpu.core_type<tc>, window_params = [{transform_indices = @transform_0, window_bounds = array<i64: 4>}, {transform_indices = @transform_1, window_bounds = array<i64: 1, 256>}, {transform_indices = @transform_2, window_bounds = array<i64: 1, 256>}, {transform_indices = @transform_3, window_bounds = array<i64: 1, 64, 16>}, {transform_indices = @transform_4, window_bounds = array<i64: 1, 4, 256>}]} {
    %c0_i32 = arith.constant 0 : i32
    %0 = arith.cmpi eq, %arg1, %c0_i32 : i32
    %1 = arith.extui %0 : i1 to i32
    %c0_i32_0 = arith.constant 0 : i32
    %2 = arith.cmpi ne, %1, %c0_i32_0 : i32
    scf.if %2 {
      %c0_23 = arith.constant 0 : index
      %c0_24 = arith.constant 0 : index
      %c0_25 = arith.constant 0 : index
      %69 = vector.load %arg5[%c0_23, %c0_24, %c0_25] : memref<1x64x16xf32, #tpu.memory_space<vmem>>, vector<1x64x16xf32>
      %70 = vector.shape_cast %69 : vector<1x64x16xf32> to vector<64x16xf32>
      %71 = arith.truncf %70 : vector<64x16xf32> to vector<64x16xbf16>
      %c0_26 = arith.constant 0 : index
      %c0_27 = arith.constant 0 : index
      %72 = vector.load %arg7[%c0_26, %c0_27] : memref<64x16xbf16, #tpu.memory_space<vmem>>, vector<64x16xbf16>
      tpu.vector_store %arg7[%c0_26, %c0_27], %71 {strides = array<i32>} : memref<64x16xbf16, #tpu.memory_space<vmem>>, vector<64x16xbf16>,
    } else {
    }
    %c2_i32 = arith.constant 2 : i32
    %3 = arith.muli %c2_i32, %arg0 : i32
    %4 = arith.index_cast %3 : i32 to index
    %5 = memref.load %arg2[%4] : memref<4xf32, #tpu.memory_space<smem>>
    %c2_i32_1 = arith.constant 2 : i32
    %6 = arith.muli %c2_i32_1, %arg0 : i32
    %c1_i32 = arith.constant 1 : i32
    %7 = arith.addi %6, %c1_i32 : i32
    %8 = arith.index_cast %7 : i32 to index
    %9 = memref.load %arg2[%8] : memref<4xf32, #tpu.memory_space<smem>>
    %c0 = arith.constant 0 : index
    %c0_2 = arith.constant 0 : index
    %10 = vector.load %arg3[%c0, %c0_2] : memref<1x256xf32, #tpu.memory_space<vmem>>, vector<1x256xf32>
    %c0_3 = arith.constant 0 : index
    %c0_4 = arith.constant 0 : index
    %11 = vector.load %arg4[%c0_3, %c0_4] : memref<1x256xf32, #tpu.memory_space<vmem>>, vector<1x256xf32>
    %cst = arith.constant 7.500000e+00 : f32
    %12 = vector.broadcast %cst : f32 to vector<1x256xf32>
    %13 = arith.subf %11, %12 : vector<1x256xf32>
    %cst_5 = arith.constant 7.500000e+00 : f32
    %14 = vector.broadcast %cst_5 : f32 to vector<1x256xf32>
    %15 = arith.subf %10, %14 : vector<1x256xf32>
    %16 = vector.broadcast %5 : f32 to vector<1x256xf32>
    %17 = arith.mulf %16, %13 : vector<1x256xf32>
    %18 = vector.broadcast %9 : f32 to vector<1x256xf32>
    %19 = arith.mulf %18, %15 : vector<1x256xf32>
    %20 = arith.subf %17, %19 : vector<1x256xf32>
    %cst_6 = arith.constant 7.500000e+00 : f32
    %21 = vector.broadcast %cst_6 : f32 to vector<1x256xf32>
    %22 = arith.addf %20, %21 : vector<1x256xf32>
    %cst_7 = arith.constant 0.000000e+00 : f32
    %cst_8 = arith.constant 1.500000e+01 : f32
    %23 = vector.broadcast %cst_7 : f32 to vector<1x256xf32>
    %24 = arith.maximumf %23, %22 : vector<1x256xf32>
    %25 = vector.broadcast %cst_8 : f32 to vector<1x256xf32>
    %26 = arith.minimumf %25, %24 : vector<1x256xf32>
    %27 = vector.broadcast %9 : f32 to vector<1x256xf32>
    %28 = arith.mulf %27, %13 : vector<1x256xf32>
    %29 = vector.broadcast %5 : f32 to vector<1x256xf32>
    %30 = arith.mulf %29, %15 : vector<1x256xf32>
    %31 = arith.addf %28, %30 : vector<1x256xf32>
    %cst_9 = arith.constant 7.500000e+00 : f32
    %32 = vector.broadcast %cst_9 : f32 to vector<1x256xf32>
    %33 = arith.addf %31, %32 : vector<1x256xf32>
    %cst_10 = arith.constant 0.000000e+00 : f32
    %cst_11 = arith.constant 1.500000e+01 : f32
    %34 = vector.broadcast %cst_10 : f32 to vector<1x256xf32>
    %35 = arith.maximumf %34, %33 : vector<1x256xf32>
    %36 = vector.broadcast %cst_11 : f32 to vector<1x256xf32>
    %37 = arith.minimumf %36, %35 : vector<1x256xf32>
    %38 = tpu.iota {dimensions = array<i32: 0>} : vector<16x1xi32>
    %39 = arith.sitofp %38 : vector<16x1xi32> to vector<16x1xf32>
    %40 = tpu.iota {dimensions = array<i32: 0>} : vector<16x1xi32>
    %41 = arith.sitofp %40 : vector<16x1xi32> to vector<16x1xf32>
    %42 = vector.broadcast %37 : vector<1x256xf32> to vector<16x256xf32>
    %43 = vector.broadcast %39 : vector<16x1xf32> to vector<16x256xf32>
    %44 = arith.subf %42, %43 : vector<16x256xf32>
    %45 = math.absf %44 : vector<16x256xf32>
    %cst_12 = arith.constant 1.000000e+00 : f32
    %46 = vector.broadcast %cst_12 : f32 to vector<16x256xf32>
    %47 = arith.subf %46, %45 : vector<16x256xf32>
    %cst_13 = arith.constant 0.000000e+00 : f32
    %48 = vector.broadcast %cst_13 : f32 to vector<16x256xf32>
    %49 = arith.maximumf %48, %47 : vector<16x256xf32>
    %50 = vector.broadcast %26 : vector<1x256xf32> to vector<16x256xf32>
    %51 = vector.broadcast %41 : vector<16x1xf32> to vector<16x256xf32>
    %52 = arith.subf %50, %51 : vector<16x256xf32>
    %53 = math.absf %52 : vector<16x256xf32>
    %cst_14 = arith.constant 1.000000e+00 : f32
    %54 = vector.broadcast %cst_14 : f32 to vector<16x256xf32>
    %55 = arith.subf %54, %53 : vector<16x256xf32>
    %cst_15 = arith.constant 0.000000e+00 : f32
    %56 = vector.broadcast %cst_15 : f32 to vector<16x256xf32>
    %57 = arith.maximumf %56, %55 : vector<16x256xf32>
    %58 = arith.truncf %57 : vector<16x256xf32> to vector<16x256xbf16>
    %c0_16 = arith.constant 0 : index
    %c0_17 = arith.constant 0 : index
    %59 = vector.load %arg7[%c0_16, %c0_17] : memref<64x16xbf16, #tpu.memory_space<vmem>>, vector<64x16xbf16>
    %cst_18 = arith.constant dense<0.000000e+00> : vector<64x256xf32>
    %60 = tpu.matmul %59, %58, %cst_18 {dimension_numbers = #tpu.dot_dimension_numbers<[1], [0], [0], [1], [0, 0, 1, 1], [], []>} : vector<64x16xbf16>, vector<16x256xbf16>, vector<64x256xf32> -> vector<64x256xf32>
    %61 = vector.shape_cast %60 : vector<64x256xf32> to vector<4x16x256xf32>
    %62 = vector.shape_cast %49 : vector<16x256xf32> to vector<1x16x256xf32>
    %63 = vector.broadcast %62 : vector<1x16x256xf32> to vector<4x16x256xf32>
    %64 = arith.mulf %61, %63 : vector<4x16x256xf32>
    %cst_19 = arith.constant dense<0.000000e+00> : vector<4x256xf32>
    %65 = vector.multi_reduction <add>, %64, %cst_19 [1] : vector<4x16x256xf32> to vector<4x256xf32>
    %c0_20 = arith.constant 0 : index
    %c0_21 = arith.constant 0 : index
    %c0_22 = arith.constant 0 : index
    %66 = vector.load %arg6[%c0_20, %c0_21, %c0_22] : memref<1x4x256xf32, #tpu.memory_space<vmem>>, vector<1x4x256xf32>
    %67 = vector.shape_cast %66 : vector<1x4x256xf32> to vector<4x256xf32>
    %68 = vector.shape_cast %65 : vector<4x256xf32> to vector<1x4x256xf32>
    tpu.vector_store %arg6[%c0_20, %c0_21, %c0_22], %68 {strides = array<i32>} : memref<1x4x256xf32, #tpu.memory_space<vmem>>, vector<1x4x256xf32>,
    return
  }
  func.func @transform_0(%arg0: i32, %arg1: i32) -> i32 {
    %c0_i32 = arith.constant 0 : i32
    %c0_i32_0 = arith.constant 0 : i32
    return %c0_i32 : i32
  }
  func.func @transform_1(%arg0: i32, %arg1: i32) -> (i32, i32) {
    %c0_i32 = arith.constant 0 : i32
    %c0_i32_0 = arith.constant 0 : i32
    return %c0_i32, %arg1 : i32, i32
  }
  func.func @transform_2(%arg0: i32, %arg1: i32) -> (i32, i32) {
    %c0_i32 = arith.constant 0 : i32
    %c0_i32_0 = arith.constant 0 : i32
    return %c0_i32, %arg1 : i32, i32
  }
  func.func @transform_3(%arg0: i32, %arg1: i32) -> (i32, i32, i32) {
    %c0_i32 = arith.constant 0 : i32
    %c0_i32_0 = arith.constant 0 : i32
    %c0_i32_1 = arith.constant 0 : i32
    return %arg0, %c0_i32, %c0_i32_0 : i32, i32, i32
  }
  func.func @transform_4(%arg0: i32, %arg1: i32) -> (i32, i32, i32) {
    %c0_i32 = arith.constant 0 : i32
    %c0_i32_0 = arith.constant 0 : i32
    return %arg0, %c0_i32, %arg1 : i32, i32, i32
  }
}

</mosaic_0001>

<bundles_post_ra>
// kernel: tpu_custom_call.1
= control target key start
LH: loop header
LB: loop body
LE: loop exit
PB: predicated region body
PF: predicated region fallthrough
CT: control target
= control target key end

     0   :  { %9 = vsyncpa [#allocation5], 0  ;;  %s1056_s0 = inlined_call_operand.vmem [shape: f32[4], index: 0, kind: input, shape index: {}]   ;;  %s1057_s1 = inlined_call_operand.vmem [shape: f32[1,256], index: 1, kind: input, shape index: {}]   ;;  %s1058_s2 = inlined_call_operand.vmem [shape: f32[1,256], index: 2, kind: input, shape index: {}]   ;;  %s1059_s3 = inlined_call_operand.vmem [shape: f32[2,64,16], index: 3, kind: input, shape index: {}]   ;;  %s1060_s4 = inlined_call_operand.hbm [shape: f32[2,4,256], index: 4, kind: output, shape index: {}]  }
   0x1   :  { %10 = vsyncpa [#allocation4], 0 }
   0x2   :  { %12 = vsyncpa [#allocation4 + $0x1], 0  ;;  %s904_s15 = smov 0   ;;  %s906_s16 = smov 0  }
   0x3   :  { %s908_s17 = smov 0   ;;  %s910_s18 = smov 0  }
   0x4   :  { %s912_s19 = smov 0   ;;  %s914_s20 = smov 0  }
   0x5 LB: > { %s682_s21 = sadd.s32 4294967295, %s874_s20   ;;  %s683_s22 = sadd.s32 4294967294, %s874_s20   ;;  %s874_s20 = sphi %s914_s20, %s18_s20   ;;  %s870_s19 = sphi %s912_s19, %s1069_s19   ;;  %s866_s18 = sphi %s910_s18, %s1068_s18   ;;  %s862_s17 = sphi %s908_s17, %s1067_s17   ;;  %s858_s16 = sphi %s906_s16, %s1066_s16   ;;  %s854_s15 = sphi %s904_s15, %s1065_s15  }
   0x6   : > { %s30_s23 = sadd.s32 1, %s870_s19  ;;  %s138_s24 = sadd.s32 1, %s862_s17 }
   0x7   : > { %p32_p0 = scmp.ge.s32.totalorder %s30_s23, 2  ;;  %p148_p1 = scmp.ne.s32.totalorder %s862_s17, %s858_s16 }
   0x8   : > { %p149_p2 = scmp.eq.s32.totalorder %s682_s21, 1  ;;  %p154_p3 = scmp.ne.s32.totalorder %s858_s16, %s854_s15 }
   0x9   : > { %s1071_s23 = smov (%p32_p0, %s30_s23), 0  ;;  %p155_p5 = scmp.eq.s32.totalorder %s683_s22, 1 }
   0xa   : > { %p944_p4 = por %p149_p2, %p148_p1  ;;  %s133_s26 = ssub.s32 %s870_s19, %s1071_s23 }
   0xb   : > { %p684_p6 = scmp.ge.s32.totalorder %s874_s20, 1  ;;  %p136_p7 = scmp.eq.s32.totalorder %s133_s26, 0 }
   0xc   : > { %p951_p8 = por %p155_p5, %p154_p3  ;;  %p162_p9 = scmp.lt.s32.totalorder %s874_s20, 3 }
   0xd   : > { %s957_s28 = scalar_select %p136_p7, %s862_s17, %s138_s24  }
   0xe   : > { %p959_p10 = pnand %p684_p6, %p162_p9  ;;  %p963_p11 = scmp.eq.s32.totalorder %s682_s21, 0 }
   0xf   : > { %s175_s7 = sshll.u32 %s1056_s0, 4  ;;  %s176_s7 = int_to_ptr.vmem [resolvable:$true] %s175_s7 }
  0x10   : > { %p716_p12 = pneg %p959_p10  ;;  %s777_s8 = scalar_lea.vmem %s176_s7, 16 }
  0x11   : > { %p778_p0 = scmp.ne.s32.totalorder %s176_s7, %s777_s8  ;;  %p785_p5 = scmp.lt.s32.totalorder %s176_s7, %s176_s7 }
  0x12   : > { %p717_p13 = pnand %p963_p11, %p716_p12  ;;  %p786_p6 = scmp.lt.s32.totalorder %s777_s8, %s777_s8 }
  0x14   : > { %p779_p1 = pneg %p717_p13  ;;  %p787_p7 = por %p786_p6, %p785_p5 }
  0x16   : > { %p780_p2 = pnand %p779_p1, %p778_p0 }
  0x18   : > { %p781_p3 = pneg %p780_p2 }
  0x1a   : > { %p788_p9 = pnand %p787_p7, %p781_p3 }
  0x1c   : > { %791 = shalt.err (!%p788_p9)
}
  0x1d   : > { %s876_s9 = smov [#allocation3]   ;;  %212 = sbr.rel (%p959_p10) target bundleno = 337 (0x151), region = 36 }
  0x1e   : > { %719 = dma.vmem_to_smem (!%p717_p13), %s176_s7, 16, %s876_s9, [#allocation5]  }
  0x24   : > { %845 = dma.done.wait (%p963_p11), [#allocation5], 16  }
  0x25   : > { %847 = vsyncadd (%p963_p11), [#allocation5], 4294967280 }
  0x26   : > { %218 = sfence }
  0x27   : > { %s694_s10 = sshll.u32 %s866_s18, 1  ;;  %v290_v0 = vld [vmem:[%s1058_s2] sm:$0x3]  ;;  %v877_v1 = vmov 0   ;;  %p257_p10 = scmp.lt.s32.totalorder %s866_s18, 1  ;;  %v307_v5 = vlaneseq  ;;  %vm280_vm0 = vcmask 130048  }
  0x28   : > { %s286_s11 = sld [smem:[#allocation3 + %s694_s10]]  ;;  %s287_s12 = sadd.s32 1, %s694_s10  ;;  %417 = vmatprep.mubr.bf16.mxu0 %v877_v1  ;;  %437 = vmatprep.mubr.bf16.mxu1 %v877_v1  ;;  %v289_v2 = vld [vmem:[%s1057_s1] sm:$0x3]  ;;  %v695_v3 = vadd.f32 -7.5, %v290_v0  ;;  %vm543_vm1 = vcmask 1041409  }
  0x29   : > { %s288_s21 = sld [smem:[#allocation3 + %s287_s12]]  ;;  %v696_v4 = vadd.f32 -7.5, %v289_v2  ;;  %v308_v15 = vshrl.u32 %v307_v5, 7  ;;  %s244_s7 = sand.u32 1, %s858_s16   ;;  %vm545_vm2 = vcmask 1045509   ;;  %vm548_vm3 = vcmask 1042434  }
  0x2a   : > { %s258_s26 = scalar_select %p257_p10, %s866_s18, 1  ;;  %vm550_vm4 = vcmask 1046534   ;;  %vm553_vm5 = vcmask 1043459   ;;  %vm555_vm6 = vcmask 1047559  }
  0x2b   : > { %v309_v29 = vadd.s32 8, %v308_v15  ;;  %v319_v32 = vsub.s32 1, %v308_v15  ;;  %v315_v33 = vsub.s32 0, %v308_v15  ;;  %v310_v36 = vcvt.s32.f32 %v308_v15  ;;  %s691_s8 = sshll.u32 %s244_s7, 3  ;;  %s707_s9 = sshll.u32 %s866_s18, 7 }
  0x2c   : > { %s706_s29 = sshll.u32 %s258_s26, 6  ;;  %s246_s10 = scalar_lea.vmem [#allocation6], %s691_s8 }
  0x2d   : > { %s261_s6 = scalar_lea.vmem %s1059_s3, %s706_s29  ;;  %v311_v37 = vcvt.s32.f32 %v309_v29  ;;  %s1009_s14 = scalar_lea.hbm %s1060_s4, %s707_s9 }
  0x2e   : > { %v293_v6 = vstv %s286_s11  ;;  %v268_v10 = vld [vmem:[%s261_s6] sm:$0xff]  ;;  %v269_v11 = vld [vmem:[%s261_s6 + $0x8] sm:$0xff]  ;;  %v270_v12 = vld [vmem:[%s261_s6 + $0x10] sm:$0xff]  ;;  %s576_s11 = sshll.u32 %s246_s10, 4  ;;  %s560_s18 = scalar_lea.sflag [#allocation4], %s244_s7  ;;  %s1011_s11 = int_to_ptr.vmem [resolvable:$true] %s576_s11 }
  0x2f   : > { %v294_v7 = vmul.f32 %v695_v3, %v293_v6  ;;  %v295_v8 = vstv %s288_s21  ;;  %v302_v9 = vmul.f32 %v696_v4, %v293_v6  ;;  %v271_v16 = vld [vmem:[%s261_s6 + $0x18] sm:$0xff]  ;;  %v272_v17 = vld [vmem:[%s261_s6 + $0x20] sm:$0xff]  ;;  %v273_v18 = vld [vmem:[%s261_s6 + $0x28] sm:$0xff]  ;;  %v276_v19 = vpack.c.bf16 %v269_v11, %v268_v10  ;;  %s792_s21 = scalar_lea.vmem %s1011_s11, 128  ;;  %s878_s22 = smov [#allocation6]  }
  0x30   : > { %v296_v13 = vmul.f32 %v696_v4, %v295_v8  ;;  %v301_v14 = vmul.f32 %v695_v3, %v295_v8  ;;  %v274_v20 = vld [vmem:[%s261_s6 + $0x30] sm:$0xff]  ;;  %v275_v21 = vld [vmem:[%s261_s6 + $0x38] sm:$0xff]  ;;  %v277_v22 = vpack.c.bf16 %v271_v16, %v270_v12  ;;  %v278_v23 = vpack.c.bf16 %v273_v18, %v272_v17  ;;  %p793_p11 = scmp.ne.s32.totalorder %s1011_s11, %s792_s21  ;;  %s796_s24 = sshll.u32 %s878_s22, 4  ;;  %s797_s24 = int_to_ptr.vmem [resolvable:$false] %s796_s24 }
  0x31   : > { %v279_v26 = vpack.c.bf16 %v275_v21, %v274_v20  ;;  %281 = vst.msk [vmem:[#allocation2] sm:$0xff] %vm280_vm0, %v276_v19  ;;  %s798_s26 = scalar_lea.vmem %s797_s24, 256  ;;  %p799_p0 = scmp.lt.s32.totalorder %s1011_s11, %s797_s24 }
  0x32   : > { %v297_v24 = vsub.f32 %v294_v7, %v296_v13  ;;  %v303_v25 = vadd.f32 %v302_v9, %v301_v14  ;;  %282 = vst.msk [vmem:[#allocation2 + $0x8] sm:$0xff] %vm280_vm0, %v277_v22  ;;  %283 = vst.msk [vmem:[#allocation2 + $0x10] sm:$0xff] %vm280_vm0, %v278_v23  ;;  %p794_p12 = pnand %p793_p11, %p944_p4  ;;  %p800_p1 = scmp.lt.s32.totalorder %s798_s26, %s792_s21 }
  0x33   : > { %284 = vst.msk [vmem:[#allocation2 + $0x18] sm:$0xff] %vm280_vm0, %v279_v26 }
  0x34   : > { %v298_v27 = vadd.f32 7.5, %v297_v24  ;;  %v304_v28 = vadd.f32 7.5, %v303_v25  ;;  %p795_p13 = pneg %p794_p12  ;;  %p801_p2 = por %p800_p1, %p799_p0 }
  0x36   : > { %v299_v30 = vmax.f32 %v298_v27, 0.0  ;;  %v305_v31 = vmax.f32 %v304_v28, 0.0  ;;  %p802_p3 = pnand %p801_p2, %p795_p13 }
  0x38   : > { %v300_v34 = vmin.f32 %v299_v30, 15.0  ;;  %v306_v35 = vmin.f32 %v305_v31, 15.0  ;;  %v368_v60 = vld [vmem:[#allocation2] sm:$0xff] }
  0x39   : > { %v370_v61 = vld [vmem:[#allocation2 + $0x10] sm:$0xff]  ;;  %v369_v62 = vld [vmem:[#allocation2 + $0x8] sm:$0xff] }
  0x3a   : > { %v320_v38 = vrot.slane %v306_v35, %v319_v32  ;;  %v347_v39 = vrot.slane %v300_v34, %v319_v32  ;;  %v316_v40 = vrot.slane %v306_v35, %v315_v33  ;;  %v343_v41 = vrot.slane %v300_v34, %v315_v33  ;;  %v371_v63 = vld [vmem:[#allocation2 + $0x18] sm:$0xff] }
  0x3c   : > { %v351_v42 = vsub.f32 %v347_v39, %v310_v36  ;;  %v353_v43 = vsub.f32 %v347_v39, %v311_v37  ;;  %v350_v44 = vsub.f32 %v343_v41, %v310_v36  ;;  %v352_v45 = vsub.f32 %v343_v41, %v311_v37 }
  0x3d   : > { %v323_v0 = vsub.f32 %v316_v40, %v310_v36  ;;  %v324_v2 = vsub.f32 %v320_v38, %v310_v36  ;;  %v325_v3 = vsub.f32 %v316_v40, %v311_v37  ;;  %v326_v4 = vsub.f32 %v320_v38, %v311_v37 }
  0x3e   : > { %v355_v46 = vand.u32 2147483647, %v351_v42  ;;  %v357_v47 = vand.u32 2147483647, %v353_v43  ;;  %v354_v48 = vand.u32 2147483647, %v350_v44 }
  0x3f   : > { %v356_v49 = vand.u32 2147483647, %v352_v45  ;;  %v327_v5 = vand.u32 2147483647, %v323_v0  ;;  %v328_v6 = vand.u32 2147483647, %v324_v2 }
  0x40   : > { %v359_v50 = vsub.f32 1.0, %v355_v46  ;;  %v361_v51 = vsub.f32 1.0, %v357_v47  ;;  %v358_v52 = vsub.f32 1.0, %v354_v48  ;;  %v329_v7 = vand.u32 2147483647, %v325_v3 }
  0x41   : > { %v360_v53 = vsub.f32 1.0, %v356_v49  ;;  %v330_v8 = vand.u32 2147483647, %v326_v4  ;;  %v331_v9 = vsub.f32 1.0, %v327_v5  ;;  %v332_v10 = vsub.f32 1.0, %v328_v6 }
  0x42   : > { %v363_v54 = vmax.f32 %v359_v50, 0.0  ;;  %v365_v55 = vmax.f32 %v361_v51, 0.0  ;;  %v362_v56 = vmax.f32 %v358_v52, 0.0  ;;  %v333_v11 = vsub.f32 1.0, %v329_v7 }
  0x43   : > { %v364_v57 = vmax.f32 %v360_v53, 0.0  ;;  %v334_v12 = vsub.f32 1.0, %v330_v8  ;;  %v335_v13 = vmax.f32 %v331_v9, 0.0 }
  0x44   : > { %v367_v58 = vpack.c.bf16 %v365_v55, %v363_v54  ;;  %v337_v14 = vmax.f32 %v333_v11, 0.0 }
  0x45   : > { %v366_v59 = vpack.c.bf16 %v364_v57, %v362_v56  ;;  %v338_v17 = vmax.f32 %v334_v12, 0.0 }
  0x46   : > { %385 = vmatprep.subr.bf16.mxu0 %v367_v58  ;;  %708 = vmatprep.subr.bf16.mxu1 %v367_v58 }
  0x47   : > { %386 = vmatpush1.bf16.msra.mxu0 %v366_v59  ;;  %709 = vmatpush1.bf16.msra.mxu1 %v366_v59 }
  0x4a   : > { %697 = vmatmul.mubr.msk.bf16.vlgmr.msra.gmra.mrb[0].mxu0 %vm280_vm0, %v368_v60  ;;  %699 = vmatmul.mubr.msk.bf16.vlgmr.msra.gmra.mrb[0].mxu1 %vm280_vm0, %v370_v61 }
  0x4b   : > { %427 = vmatprep.mubr.bf16.mxu0 %v877_v1  ;;  %447 = vmatprep.mubr.bf16.mxu1 %v877_v1  ;;  %v336_v1 = vmax.f32 %v332_v10, 0.0 }
  0x52   : > { %698 = vmatmul.mubr.msk.bf16.gmra.mrb[4].mxu0 %vm280_vm0, %v369_v62  ;;  %700 = vmatmul.mubr.msk.bf16.gmra.mrb[4].mxu1 %vm280_vm0, %v371_v63 }
 0x11d   : > { %v419_v15 = vpop.f32.mrb[0].mxu0  ;;  %v439_v16 = vpop.f32.mrb[0].mxu1 }
 0x11e   : > { %v458_v18 = vmul.f32 %v419_v15, %v335_v13  ;;  %v466_v19 = vmul.f32 %v439_v16, %v335_v13  ;;  %v421_v20 = vpop.f32.mrb[1].mxu0  ;;  %v441_v21 = vpop.f32.mrb[1].mxu1 }
 0x11f   : > { %v459_v22 = vmul.f32 %v421_v20, %v336_v1  ;;  %v467_v23 = vmul.f32 %v441_v21, %v336_v1  ;;  %v423_v24 = vpop.f32.mrb[2].mxu0  ;;  %v443_v25 = vpop.f32.mrb[2].mxu1 }
 0x120   : > { %v460_v26 = vmul.f32 %v423_v24, %v337_v14  ;;  %v468_v27 = vmul.f32 %v443_v25, %v337_v14  ;;  %v425_v28 = vpop.f32.mrb[3].mxu0  ;;  %v445_v29 = vpop.f32.mrb[3].mxu1 }
 0x121   : > { %v461_v30 = vmul.f32 %v425_v28, %v338_v17  ;;  %v469_v31 = vmul.f32 %v445_v29, %v338_v17 }
 0x122   : > { %v474_v32 = vadd.f32 %v460_v26, %v458_v18  ;;  %v502_v33 = vadd.f32 %v468_v27, %v466_v19 }
 0x123   : > { %v481_v34 = vadd.f32 %v461_v30, %v459_v22  ;;  %v509_v35 = vadd.f32 %v469_v31, %v467_v23 }
 0x124   : > { %v475_v36 = vrot.slane %v474_v32, 4  ;;  %v503_v37 = vrot.slane %v502_v33, 4 }
 0x125   : > { %v482_v38 = vrot.slane %v481_v34, 4  ;;  %v510_v39 = vrot.slane %v509_v35, 4  ;;  %v429_v40 = vpop.f32.mrb[4].mxu0  ;;  %v449_v41 = vpop.f32.mrb[4].mxu1 }
 0x126   : > { %v476_v42 = vadd.f32 %v475_v36, %v474_v32  ;;  %v504_v43 = vadd.f32 %v503_v37, %v502_v33  ;;  %v462_v44 = vmul.f32 %v429_v40, %v335_v13  ;;  %v470_v45 = vmul.f32 %v449_v41, %v335_v13  ;;  %v431_v46 = vpop.f32.mrb[5].mxu0  ;;  %v451_v47 = vpop.f32.mrb[5].mxu1 }
 0x127   : > { %v483_v48 = vadd.f32 %v482_v38, %v481_v34  ;;  %v511_v49 = vadd.f32 %v510_v39, %v509_v35  ;;  %v463_v50 = vmul.f32 %v431_v46, %v336_v1  ;;  %v471_v51 = vmul.f32 %v451_v47, %v336_v1  ;;  %v433_v52 = vpop.f32.mrb[6].mxu0  ;;  %v453_v53 = vpop.f32.mrb[6].mxu1 }
 0x128   : > { %v477_v54 = vrot.slane %v476_v42, 2  ;;  %v505_v55 = vrot.slane %v504_v43, 2  ;;  %v464_v56 = vmul.f32 %v433_v52, %v337_v14  ;;  %v472_v57 = vmul.f32 %v453_v53, %v337_v14  ;;  %v435_v58 = vpop.f32.mrb[7].mxu0  ;;  %v455_v59 = vpop.f32.mrb[7].mxu1 }
 0x129   : > { %v484_v60 = vrot.slane %v483_v48, 2  ;;  %v512_v61 = vrot.slane %v511_v49, 2  ;;  %v465_v62 = vmul.f32 %v435_v58, %v338_v17  ;;  %v473_v63 = vmul.f32 %v455_v59, %v338_v17 }
 0x12a   : > { %v478_v0 = vadd.f32 %v477_v54, %v476_v42  ;;  %v506_v2 = vadd.f32 %v505_v55, %v504_v43  ;;  %v488_v3 = vadd.f32 %v464_v56, %v462_v44  ;;  %v516_v4 = vadd.f32 %v472_v57, %v470_v45 }
 0x12b   : > { %v485_v5 = vadd.f32 %v484_v60, %v483_v48  ;;  %v513_v6 = vadd.f32 %v512_v61, %v511_v49  ;;  %v495_v7 = vadd.f32 %v465_v62, %v463_v50  ;;  %v523_v8 = vadd.f32 %v473_v63, %v471_v51 }
 0x12c   : > { %v479_v9 = vrot.slane %v478_v0, 1  ;;  %v507_v10 = vrot.slane %v506_v2, 1  ;;  %v489_v11 = vrot.slane %v488_v3, 4  ;;  %v517_v12 = vrot.slane %v516_v4, 4 }
 0x12d   : > { %v486_v13 = vrot.slane %v485_v5, 1  ;;  %v514_v1 = vrot.slane %v513_v6, 1  ;;  %v496_v14 = vrot.slane %v495_v7, 4  ;;  %v524_v15 = vrot.slane %v523_v8, 4 }
 0x12e   : > { %v480_v16 = vadd.f32 %v479_v9, %v478_v0  ;;  %v508_v18 = vadd.f32 %v507_v10, %v506_v2  ;;  %v490_v19 = vadd.f32 %v489_v11, %v488_v3  ;;  %v518_v17 = vadd.f32 %v517_v12, %v516_v4 }
 0x12f   : > { %v487_v20 = vadd.f32 %v486_v13, %v485_v5  ;;  %v515_v21 = vadd.f32 %v514_v1, %v513_v6  ;;  %v497_v22 = vadd.f32 %v496_v14, %v495_v7  ;;  %v525_v23 = vadd.f32 %v524_v15, %v523_v8 }
 0x130   : > { %v491_v24 = vrot.slane %v490_v19, 2  ;;  %v519_v25 = vrot.slane %v518_v17, 2 }
 0x131   : > { %v538_v26 = vcombine.low %v480_v16, %v487_v20  ;;  %v540_v27 = vcombine.low %v508_v18, %v515_v21  ;;  %v498_v28 = vrot.slane %v497_v22, 2  ;;  %v526_v29 = vrot.slane %v525_v23, 2 }
 0x132   : > { %v492_v30 = vadd.f32 %v491_v24, %v490_v19  ;;  %v520_v31 = vadd.f32 %v519_v25, %v518_v17 }
 0x133   : > { %v499_v32 = vadd.f32 %v498_v28, %v497_v22  ;;  %v527_v33 = vadd.f32 %v526_v29, %v525_v23  ;;  %v547_v45 = vrot.slane %v540_v27, 6 }
 0x134   : > { %v493_v34 = vrot.slane %v492_v30, 1  ;;  %v521_v35 = vrot.slane %v520_v31, 1 }
 0x135   : > { %v500_v36 = vrot.slane %v499_v32, 1  ;;  %v528_v37 = vrot.slane %v527_v33, 1 }
 0x136   : > { %v494_v38 = vadd.f32 %v493_v34, %v492_v30  ;;  %v522_v39 = vadd.f32 %v521_v35, %v520_v31 }
 0x137   : > { %v501_v40 = vadd.f32 %v500_v36, %v499_v32  ;;  %v529_v41 = vadd.f32 %v528_v37, %v527_v33 }
 0x139   : > { %v539_v42 = vcombine.low %v494_v38, %v501_v40  ;;  %v541_v43 = vcombine.low %v522_v39, %v529_v41 }
 0x13b   : > { %v542_v44 = vrot.slane %v539_v42, 7  ;;  %v552_v49 = vrot.slane %v541_v43, 5 }
 0x13d   : > { %v544_v46 = vsel %vm543_vm1, %v542_v44, %v538_v26 }
 0x13e   : > { %v546_v47 = vsel %vm545_vm2, %v542_v44, %v544_v46 }
 0x13f   : > { %v549_v48 = vsel %vm548_vm3, %v547_v45, %v546_v47 }
 0x140   : > { %v551_v50 = vsel %vm550_vm4, %v547_v45, %v549_v48 }
 0x141   : > { %v554_v51 = vsel %vm553_vm5, %v552_v49, %v551_v50 }
 0x142   : > { %v556_v52 = vsel %vm555_vm6, %v552_v49, %v554_v51 }
 0x143   : > { %558 = vst [vmem:[%s246_s10] sm:$0xff] %v556_v52 }
 0x144   : > { %805 = shalt.err (!%p802_p3)
}
 0x145   : > { %s806_s29 = scalar_lea.hbm %s1009_s14, 128  ;;  %s810_s6 = scalar_lea.hbm %s1060_s4, 256 }
 0x146   : > { %p807_p5 = scmp.ne.s32.totalorder %s1009_s14, %s806_s29  ;;  %p811_p9 = scmp.lt.u32.totalorder %s1009_s14, %s1060_s4 }
 0x147   : > { %p812_p10 = scmp.lt.u32.totalorder %s810_s6, %s806_s29  ;;  %p814_p12 = scmp.lt.u32.totalorder %s806_s29, %s1009_s14 }
 0x148   : > { %p808_p6 = pnand %p807_p5, %p944_p4 }
 0x149   : > { %p813_p11 = por %p812_p10, %p811_p9 }
 0x14a   : > { %p809_p7 = pneg %p808_p6 }
 0x14b   : > { %p815_p13 = por %p814_p12, %p813_p11 }
 0x14d   : > { %p816_p0 = pnand %p815_p13, %p809_p7 }
 0x14f   : > { %819 = shalt.err (!%p816_p0)
}
 0x150   : > { %714 = dma.vmem_to_hbm [thread:$0]  (%p944_p4), %s1011_s11, 128, %s1009_s14, %s560_s18  }
 0x151 PF: > { %p726_p1 = scmp.ge.s32.totalorder %s874_s20, 2  ;;  %s588_s9 = sand.u32 1, %s854_s15  }
 0x152   : > { %s589_s10 = scalar_lea.sflag [#allocation4], %s588_s9 }
 0x153   : > { %p721_p2 = pnand %p726_p1, %p951_p8 }
 0x155   : > { %849 = dma.done.wait (!%p721_p2), %s589_s10, 128  }
 0x156   : > { %851 = vsyncadd (!%p721_p2), %s589_s10, 4294967168  ;;  %s18_s20 = sadd.s32 1, %s874_s20   ;;  %s1065_s15 = smov %s858_s16 }
 0x157   : > { %p15_p3 = scmp.ge.s32.totalorder %s18_s20, 4   ;;  %s1066_s16 = smov %s862_s17 }
 0x158   : > { %s1067_s17 = smov %s957_s28  ;;  %s1068_s18 = smov %s870_s19 }
 0x159   : > { %s1069_s19 = smov %s1071_s23  ;;  %17 = sbr.rel (!%p15_p3) target bundleno = 5 (0x5), region = 86 }
 0x160   :  { %594 = vsyncpa [#allocation4], 1 }
 0x161   :  { %596 = vsyncpa [#allocation4 + $0x1], 1 }
 0x162   :  { %597 = vsyncpa [#allocation5], 1 }
 0x163   :  { %599 = vsyncpa [#allocation5 + $0x1], 1 }

</bundles_post_ra>
